<compile_context>
chip_gen: v7x
topology: tpu7x:2x2x1
jax: 0.10.0
libtpu: 0.0.40
codegen_flags: <defaults>
</compile_context>

<pallas_src>
import functools

import jax
import jax.numpy as jnp
from jax.experimental import pallas as pl
from jax.experimental.pallas import tpu as pltpu


def _round_up(v, m):
    return ((v + m - 1) // m) * m


def asrnorm_in_kernel(eps, hw, cs,
                      scal_ref,                      # SMEM (4,): [l_mu, l_sigma, l_beta, l_gamma]
                      x_ref,                         # VMEM (tn, C, HW), caller dtype
                      w_enc_ref, b_enc_ref,          # (C, Cs+Cr), (1, Cs+Cr)   [w_se | w_re]
                      w_sdec_ref, b_sdec_ref,        # (Cs, 2C),   (1, 2C)      [w_smd | w_ssd]
                      w_rdec_ref, b_rdec_ref,        # (Cr, 2C),   (1, 2C)      [w_rbd | w_rgd]
                      bias_beta_ref, bias_gamma_ref,  # (1, C), (1, C)
                      o_ref):                        # VMEM (tn, C, HW), out dtype
    x = x_ref[...].astype(jnp.float32)               # upcast once; math stays f32
    tn, c, _ = x.shape

    # ---- two-pass per-(n,c) statistics over the full spatial extent ----
    # (block covers the whole HW axis; Mosaic masks the ragged lane tail)
    x_mean = jnp.sum(x, axis=-1) * (1.0 / hw)         # (tn, C)
    diff = x - x_mean[:, :, None]
    # unbiased variance (divisor hw-1): matches torch.var's default
    var = jnp.sum(diff * diff, axis=-1) * (1.0 / (hw - 1.0))
    x_std = jnp.sqrt(var + eps)                       # (tn, C)

    # ---- fused encoder: rows = [x_mean ; x_std], cols = [w_se | w_re] ----
    h = jnp.concatenate([x_mean, x_std], axis=0)      # (2tn, C)
    enc = jnp.dot(h, w_enc_ref[...], preferred_element_type=jnp.float32) + b_enc_ref[...]
    enc = jax.nn.relu(enc)                            # every decoder applies relu first
    enc_s = enc[:, :cs]                               # (2tn, Cs)
    enc_r = enc[:, cs:]                               # (2tn, Cr)

    # ---- fused decoders: cols = [mean_dec | std_dec] / [beta_dec | gamma_dec] ----
    sdec = jnp.dot(enc_s, w_sdec_ref[...], preferred_element_type=jnp.float32) + b_sdec_ref[...]
    rdec = jnp.dot(enc_r, w_rdec_ref[...], preferred_element_type=jnp.float32) + b_rdec_ref[...]

    x_standard_mean = sdec[:tn, :c]                   # relu(enc_mean) @ w_smd + b_smd
    x_standard_std = jax.nn.relu(sdec[tn:, c:])       # relu(relu(enc_std) @ w_ssd + b_ssd)
    beta_pre = jnp.tanh(rdec[:tn, :c])                # tanh(relu(renc_mean) @ w_rbd + b_rbd)
    gamma_pre = jax.nn.sigmoid(rdec[tn:, c:])         # sigmoid(relu(renc_std) @ w_rgd + b_rgd)

    l_mu = scal_ref[0]
    l_sigma = scal_ref[1]
    l_beta = scal_ref[2]
    l_gamma = scal_ref[3]

    mean = l_mu * x_standard_mean + (1.0 - l_mu) * x_mean      # (tn, C)
    std = l_sigma * x_standard_std + (1.0 - l_sigma) * x_std   # (tn, C)
    beta = l_beta * beta_pre + bias_beta_ref[...]              # (tn, C)
    gamma = l_gamma * gamma_pre + bias_gamma_ref[...]          # (tn, C)

    # ---- fold (x - mean)/std * gamma + beta into one scale/offset FMA ----
    inv_std = 1.0 / std                                        # divide only on tiny (tn, C)
    scale = gamma * inv_std
    offset = beta - mean * scale
    o_ref[...] = (x * scale[:, :, None] + offset[:, :, None]).astype(o_ref.dtype)


def prepare_params(params):
    """One-time parameter preparation: fuse the six Linear layers into three
    matmul operands (hoisted out of the per-call wrapper)."""
    f32 = lambda a: jnp.asarray(a, jnp.float32)
    return {
        "scalars": f32(params["scalars"]),
        "w_enc": jnp.concatenate([f32(params["w_se"]), f32(params["w_re"])], axis=1),
        "b_enc": jnp.concatenate([f32(params["b_se"]), f32(params["b_re"])], axis=1),
        "w_sdec": jnp.concatenate([f32(params["w_smd"]), f32(params["w_ssd"])], axis=1),
        "b_sdec": jnp.concatenate([f32(params["b_smd"]), f32(params["b_ssd"])], axis=1),
        "w_rdec": jnp.concatenate([f32(params["w_rbd"]), f32(params["w_rgd"])], axis=1),
        "b_rdec": jnp.concatenate([f32(params["b_rbd"]), f32(params["b_rgd"])], axis=1),
        "bias_beta": f32(params["bias_beta"]),
        "bias_gamma": f32(params["bias_gamma"]),
        "cs": int(params["w_se"].shape[1]),
    }


def asrnorm_in(x, fused, eps=1e-6, block_n=None, out_dtype=None):
    """x: (N, C, H, W) float (f32 or bf16).  fused: output of prepare_params()."""
    N, C, H, W = x.shape
    HW = H * W
    assert HW >= 2, "unbiased variance (torch.var default) needs H*W >= 2"
    if out_dtype is None:
        out_dtype = x.dtype

    # Contiguous reshape: no HBM copy.  No padding, no output slice — the grid
    # uses cdiv on the batch axis (partial last block is masked by Pallas) and
    # the last two block dims are full-extent, so ragged C / HW is legal.
    x3 = x.reshape(N, C, HW)

    # per-sample VMEM footprint (f32, padded to the (8,128) tile grid)
    sample_vmem = _round_up(C, 8) * _round_up(HW, 128) * 4
    if block_n is None:
        # ~4 MiB blocks amortize the ~0.35 us per-grid-step overhead while
        # double-buffered in+out plus kernel temporaries fit every generation.
        block_n = max(1, (4 << 20) // max(sample_vmem, 1))
        if N >= 4:
            # keep >= 4 grid steps so both v7x TensorCores get work
            block_n = min(block_n, -(-N // 4))
    block_n = max(1, min(block_n, N))
    grid = (pl.cdiv(N, block_n),)

    block_vmem = block_n * sample_vmem
    # in + out double-buffered (~4x) + ~3 block-sized temporaries + weights
    vmem_limit = int(min(max(7 * block_vmem + (8 << 20), 16 << 20), 64 << 20))

    kernel = functools.partial(asrnorm_in_kernel, float(eps), float(HW), fused["cs"])

    def resident(arr):
        nd = arr.ndim
        # full-array block with constant index -> stays resident across grid steps
        return pl.BlockSpec(arr.shape, lambda i, _nd=nd: (0,) * _nd)

    x_spec = pl.BlockSpec((block_n, C, HW), lambda i: (i, 0, 0))
    smem_spec = pl.BlockSpec(memory_space=pltpu.MemorySpace.SMEM)

    in_bytes = jnp.dtype(x.dtype).itemsize
    out_bytes = jnp.dtype(out_dtype).itemsize
    cost = pl.CostEstimate(
        flops=int(8 * N * C * HW),
        transcendentals=int(3 * N * C),
        bytes_accessed=int(N * C * HW * (in_bytes + out_bytes)),
    )

    out3 = pl.pallas_call(
        kernel,
        out_shape=jax.ShapeDtypeStruct((N, C, HW), out_dtype),
        grid=grid,
        in_specs=[
            smem_spec,                       # scalars
            x_spec,                          # x
            resident(fused["w_enc"]), resident(fused["b_enc"]),
            resident(fused["w_sdec"]), resident(fused["b_sdec"]),
            resident(fused["w_rdec"]), resident(fused["b_rdec"]),
            resident(fused["bias_beta"]), resident(fused["bias_gamma"]),
        ],
        out_specs=x_spec,
        compiler_params=pltpu.CompilerParams(
            dimension_semantics=("parallel",),
            vmem_limit_bytes=vmem_limit),
        cost_estimate=cost,
    )(
        fused["scalars"], x3,
        fused["w_enc"], fused["b_enc"],
        fused["w_sdec"], fused["b_sdec"],
        fused["w_rdec"], fused["b_rdec"],
        fused["bias_beta"], fused["bias_gamma"],
    )

    return out3.reshape(N, C, H, W)


def init_params(key, dim):
    """Deterministic synthetic init matching the PyTorch module's shapes."""
    cs = dim // 2        # stan_mid_channel
    cr = dim // 16       # rsc_mid_channel (dim must be >= 16)
    ks = jax.random.split(key, 12)

    def lin(kw, kb, fan_in, fan_out):
        bound = 1.0 / jnp.sqrt(jnp.float32(fan_in))
        w = jax.random.uniform(kw, (fan_in, fan_out), jnp.float32, -bound, bound)
        b = jax.random.uniform(kb, (1, fan_out), jnp.float32, -bound, bound)
        return w, b

    w_se, b_se = lin(ks[0], ks[1], dim, cs)
    w_smd, b_smd = lin(ks[2], ks[3], cs, dim)
    w_ssd, b_ssd = lin(ks[4], ks[5], cs, dim)
    w_re, b_re = lin(ks[6], ks[7], dim, cr)
    w_rbd, b_rbd = lin(ks[8], ks[9], cr, dim)
    w_rgd, b_rgd = lin(ks[10], ks[11], cr, dim)

    # lambda_mu / lambda_sigma params are init'd to sigmoid(-3) and the forward
    # applies another sigmoid; lambda_beta / lambda_gamma (init sigmoid(-5))
    # are used directly.
    l_mu = jax.nn.sigmoid(jax.nn.sigmoid(jnp.float32(-3.0)))
    l_sigma = jax.nn.sigmoid(jax.nn.sigmoid(jnp.float32(-3.0)))
    l_beta = jax.nn.sigmoid(jnp.float32(-5.0))
    l_gamma = jax.nn.sigmoid(jnp.float32(-5.0))
    scalars = jnp.stack([l_mu, l_sigma, l_beta, l_gamma]).astype(jnp.float32)

    return {
        "scalars": scalars,
        "w_se": w_se, "b_se": b_se,
        "w_smd": w_smd, "b_smd": b_smd,
        "w_ssd": w_ssd, "b_ssd": b_ssd,
        "w_re": w_re, "b_re": b_re,
        "w_rbd": w_rbd, "b_rbd": b_rbd,
        "w_rgd": w_rgd, "b_rgd": b_rgd,
        "bias_beta": jnp.zeros((1, dim), jnp.float32),
        "bias_gamma": jnp.ones((1, dim), jnp.float32),
    }


def asrnorm_in_reference(x, params, eps=1e-6):
    """Pure-JAX reference mirroring the PyTorch forward (unfused)."""
    N, C, H, W = x.shape
    x_mean = jnp.mean(x, axis=(2, 3))
    x_std = jnp.sqrt(jnp.var(x, axis=(2, 3), ddof=1) + eps)

    def lin(h, w, b):
        return h @ w + b

    enc_m = lin(x_mean, params["w_se"], params["b_se"])
    enc_s = lin(x_std, params["w_se"], params["b_se"])
    xsm = lin(jax.nn.relu(enc_m), params["w_smd"], params["b_smd"])
    xss = jax.nn.relu(lin(jax.nn.relu(enc_s), params["w_ssd"], params["b_ssd"]))
    l_mu, l_sigma, l_beta, l_gamma = params["scalars"]
    mean = l_mu * xsm + (1 - l_mu) * x_mean
    std = l_sigma * xss + (1 - l_sigma) * x_std
    xh = (x - mean[:, :, None, None]) / std[:, :, None, None]
    renc_m = lin(x_mean, params["w_re"], params["b_re"])
    renc_s = lin(x_std, params["w_re"], params["b_re"])
    beta_pre = jnp.tanh(lin(jax.nn.relu(renc_m), params["w_rbd"], params["b_rbd"]))
    gamma_pre = jax.nn.sigmoid(lin(jax.nn.relu(renc_s), params["w_rgd"], params["b_rgd"]))
    beta = l_beta * beta_pre + params["bias_beta"]
    gamma = l_gamma * gamma_pre + params["bias_gamma"]
    return xh * gamma[:, :, None, None] + beta[:, :, None, None]


if __name__ == "__main__":
    key = jax.random.PRNGKey(0)
    kx, kp, kx2 = jax.random.split(key, 3)

    # Case 1: lane-dense spatial axis (HW = 256). C >= 16 so rsc_mid_channel >= 1.
    N, C, H, W = 2, 32, 16, 16
    x = jax.random.normal(kx, (N, C, H, W), jnp.float32)
    raw = init_params(kp, C)
    fused = prepare_params(raw)

    out = jax.block_until_ready(asrnorm_in(x, fused))
    ref = asrnorm_in_reference(x, raw)
    assert out.shape == (N, C, H, W) and out.dtype == jnp.float32
    assert jnp.allclose(out, ref, atol=1e-4, rtol=1e-4), "mismatch vs reference (case 1)"

    # Same case with an explicit smaller block so the grid has 2 steps.
    out_g = jax.block_until_ready(asrnorm_in(x, fused, block_n=1))
    assert jnp.allclose(out_g, ref, atol=1e-4, rtol=1e-4), "mismatch vs reference (gridded)"

    # Case 2: ragged spatial (HW = 35, not a multiple of 128) and a partial
    # last batch block (N=3, block_n=2) — no HBM-side padding or slicing.
    N2, H2, W2 = 3, 5, 7
    x2 = jax.random.normal(kx2, (N2, C, H2, W2), jnp.float32)
    out2 = jax.block_until_ready(asrnorm_in(x2, fused, block_n=2))
    ref2 = asrnorm_in_reference(x2, raw)
    assert out2.shape == (N2, C, H2, W2)
    assert jnp.allclose(out2, ref2, atol=1e-4, rtol=1e-4), "mismatch vs reference (case 2)"

    # Case 3: bf16 in / bf16 out (halves HBM traffic); math stays f32 in-kernel.
    x_bf = x.astype(jnp.bfloat16)
    out_bf = jax.block_until_ready(asrnorm_in(x_bf, fused, block_n=1))
    assert out_bf.dtype == jnp.bfloat16
    ref_bf = asrnorm_in_reference(x_bf.astype(jnp.float32), raw)
    assert jnp.allclose(out_bf.astype(jnp.float32), ref_bf, atol=3e-2, rtol=3e-2), \
        "mismatch vs reference (bf16)"

    print("KERNEL_OK")
</pallas_src>

<mosaic_0001>
module attributes {stable_mosaic.version = 11 : i64} {
  func.func @asrnorm_in_kernel(%arg0: i32, %arg1: memref<4xf32, #tpu.memory_space<smem>>, %arg2: memref<2x32x256xf32, #tpu.memory_space<vmem>>, %arg3: memref<32x18xf32, #tpu.memory_space<vmem>>, %arg4: memref<1x18xf32, #tpu.memory_space<vmem>>, %arg5: memref<16x64xf32, #tpu.memory_space<vmem>>, %arg6: memref<1x64xf32, #tpu.memory_space<vmem>>, %arg7: memref<2x64xf32, #tpu.memory_space<vmem>>, %arg8: memref<1x64xf32, #tpu.memory_space<vmem>>, %arg9: memref<1x32xf32, #tpu.memory_space<vmem>>, %arg10: memref<1x32xf32, #tpu.memory_space<vmem>>, %arg11: memref<2x32x256xf32, #tpu.memory_space<vmem>>) attributes {dimension_semantics = [#tpu.dimension_semantics<parallel>], iteration_bounds = array<i64: 1>, scalar_prefetch = 0 : i64, scratch_operands = 0 : i64, tpu.core_type = #tpu.core_type<tc>, window_params = [{transform_indices = @transform_0, window_bounds = array<i64: 4>}, {transform_indices = @transform_1, window_bounds = array<i64: 2, 32, 256>}, {pipeline_mode = #tpu.pipeline_mode<synchronous>, transform_indices = @transform_2, window_bounds = array<i64: 32, 18>}, {pipeline_mode = #tpu.pipeline_mode<synchronous>, transform_indices = @transform_3, window_bounds = array<i64: 1, 18>}, {pipeline_mode = #tpu.pipeline_mode<synchronous>, transform_indices = @transform_4, window_bounds = array<i64: 16, 64>}, {pipeline_mode = #tpu.pipeline_mode<synchronous>, transform_indices = @transform_5, window_bounds = array<i64: 1, 64>}, {pipeline_mode = #tpu.pipeline_mode<synchronous>, transform_indices = @transform_6, window_bounds = array<i64: 2, 64>}, {pipeline_mode = #tpu.pipeline_mode<synchronous>, transform_indices = @transform_7, window_bounds = array<i64: 1, 64>}, {pipeline_mode = #tpu.pipeline_mode<synchronous>, transform_indices = @transform_8, window_bounds = array<i64: 1, 32>}, {pipeline_mode = #tpu.pipeline_mode<synchronous>, transform_indices = @transform_9, window_bounds = array<i64: 1, 32>}, {transform_indices = @transform_10, window_bounds = array<i64: 2, 32, 256>}]} {
    %c0 = arith.constant 0 : index
    %c0_0 = arith.constant 0 : index
    %c0_1 = arith.constant 0 : index
    %0 = vector.load %arg2[%c0, %c0_0, %c0_1] : memref<2x32x256xf32, #tpu.memory_space<vmem>>, vector<2x32x256xf32>
    %cst = arith.constant dense<0.000000e+00> : vector<2x32xf32>
    %1 = vector.multi_reduction <add>, %0, %cst [2] : vector<2x32x256xf32> to vector<2x32xf32>
    %cst_2 = arith.constant 3.906250e-03 : f32
    %2 = vector.broadcast %cst_2 : f32 to vector<2x32xf32>
    %3 = arith.mulf %1, %2 : vector<2x32xf32>
    %4 = vector.shape_cast %3 : vector<2x32xf32> to vector<2x32x1xf32>
    %5 = vector.broadcast %4 : vector<2x32x1xf32> to vector<2x32x256xf32>
    %6 = arith.subf %0, %5 : vector<2x32x256xf32>
    %7 = arith.mulf %6, %6 : vector<2x32x256xf32>
    %cst_3 = arith.constant dense<0.000000e+00> : vector<2x32xf32>
    %8 = vector.multi_reduction <add>, %7, %cst_3 [2] : vector<2x32x256xf32> to vector<2x32xf32>
    %cst_4 = arith.constant 0.00392156886 : f32
    %9 = vector.broadcast %cst_4 : f32 to vector<2x32xf32>
    %10 = arith.mulf %8, %9 : vector<2x32xf32>
    %cst_5 = arith.constant 9.99999997E-7 : f32
    %11 = vector.broadcast %cst_5 : f32 to vector<2x32xf32>
    %12 = arith.addf %10, %11 : vector<2x32xf32>
    %13 = math.sqrt %12 : vector<2x32xf32>
    %14 = tpu.concatenate %3, %13 in 0 : vector<2x32xf32>, vector<2x32xf32> -> vector<4x32xf32>
    %c0_6 = arith.constant 0 : index
    %c0_7 = arith.constant 0 : index
    %15 = vector.load %arg3[%c0_6, %c0_7] : memref<32x18xf32, #tpu.memory_space<vmem>>, vector<32x18xf32>
    %cst_8 = arith.constant dense<0.000000e+00> : vector<4x18xf32>
    %16 = tpu.matmul %14, %15, %cst_8 {dimension_numbers = #tpu.dot_dimension_numbers<[1], [0], [0], [1], [0, 0, 1, 1], [], []>} : vector<4x32xf32>, vector<32x18xf32>, vector<4x18xf32> -> vector<4x18xf32>
    %c0_9 = arith.constant 0 : index
    %c0_10 = arith.constant 0 : index
    %17 = vector.load %arg4[%c0_9, %c0_10] : memref<1x18xf32, #tpu.memory_space<vmem>>, vector<1x18xf32>
    %18 = vector.broadcast %17 : vector<1x18xf32> to vector<4x18xf32>
    %19 = arith.addf %16, %18 : vector<4x18xf32>
    %cst_11 = arith.constant 0.000000e+00 : f32
    %20 = vector.broadcast %cst_11 : f32 to vector<4x18xf32>
    %21 = arith.maximumf %19, %20 : vector<4x18xf32>
    %22 = vector.extract_strided_slice %21 {offsets = [0, 0], sizes = [4, 16], strides = [1, 1]} : vector<4x18xf32> to vector<4x16xf32>
    %23 = vector.extract_strided_slice %21 {offsets = [0, 16], sizes = [4, 2], strides = [1, 1]} : vector<4x18xf32> to vector<4x2xf32>
    %c0_12 = arith.constant 0 : index
    %c0_13 = arith.constant 0 : index
    %24 = vector.load %arg5[%c0_12, %c0_13] : memref<16x64xf32, #tpu.memory_space<vmem>>, vector<16x64xf32>
    %cst_14 = arith.constant dense<0.000000e+00> : vector<4x64xf32>
    %25 = tpu.matmul %22, %24, %cst_14 {dimension_numbers = #tpu.dot_dimension_numbers<[1], [0], [0], [1], [0, 0, 1, 1], [], []>} : vector<4x16xf32>, vector<16x64xf32>, vector<4x64xf32> -> vector<4x64xf32>
    %c0_15 = arith.constant 0 : index
    %c0_16 = arith.constant 0 : index
    %26 = vector.load %arg6[%c0_15, %c0_16] : memref<1x64xf32, #tpu.memory_space<vmem>>, vector<1x64xf32>
    %27 = vector.broadcast %26 : vector<1x64xf32> to vector<4x64xf32>
    %28 = arith.addf %25, %27 : vector<4x64xf32>
    %c0_17 = arith.constant 0 : index
    %c0_18 = arith.constant 0 : index
    %29 = vector.load %arg7[%c0_17, %c0_18] : memref<2x64xf32, #tpu.memory_space<vmem>>, vector<2x64xf32>
    %cst_19 = arith.constant dense<0.000000e+00> : vector<4x64xf32>
    %30 = tpu.matmul %23, %29, %cst_19 {dimension_numbers = #tpu.dot_dimension_numbers<[1], [0], [0], [1], [0, 0, 1, 1], [], []>} : vector<4x2xf32>, vector<2x64xf32>, vector<4x64xf32> -> vector<4x64xf32>
    %c0_20 = arith.constant 0 : index
    %c0_21 = arith.constant 0 : index
    %31 = vector.load %arg8[%c0_20, %c0_21] : memref<1x64xf32, #tpu.memory_space<vmem>>, vector<1x64xf32>
    %32 = vector.broadcast %31 : vector<1x64xf32> to vector<4x64xf32>
    %33 = arith.addf %30, %32 : vector<4x64xf32>
    %34 = vector.extract_strided_slice %28 {offsets = [0, 0], sizes = [2, 32], strides = [1, 1]} : vector<4x64xf32> to vector<2x32xf32>
    %35 = vector.extract_strided_slice %28 {offsets = [2, 32], sizes = [2, 32], strides = [1, 1]} : vector<4x64xf32> to vector<2x32xf32>
    %cst_22 = arith.constant 0.000000e+00 : f32
    %36 = vector.broadcast %cst_22 : f32 to vector<2x32xf32>
    %37 = arith.maximumf %35, %36 : vector<2x32xf32>
    %38 = vector.extract_strided_slice %33 {offsets = [0, 0], sizes = [2, 32], strides = [1, 1]} : vector<4x64xf32> to vector<2x32xf32>
    %39 = math.tanh %38 : vector<2x32xf32>
    %40 = vector.extract_strided_slice %33 {offsets = [2, 32], sizes = [2, 32], strides = [1, 1]} : vector<4x64xf32> to vector<2x32xf32>
    %41 = arith.negf %40 : vector<2x32xf32>
    %42 = math.exp %41 : vector<2x32xf32>
    %cst_23 = arith.constant 1.000000e+00 : f32
    %43 = vector.broadcast %cst_23 : f32 to vector<2x32xf32>
    %44 = arith.addf %43, %42 : vector<2x32xf32>
    %45 = arith.divf %43, %44 : vector<2x32xf32>
    %c0_24 = arith.constant 0 : index
    %46 = memref.load %arg1[%c0_24] : memref<4xf32, #tpu.memory_space<smem>>
    %c1 = arith.constant 1 : index
    %47 = memref.load %arg1[%c1] : memref<4xf32, #tpu.memory_space<smem>>
    %c2 = arith.constant 2 : index
    %48 = memref.load %arg1[%c2] : memref<4xf32, #tpu.memory_space<smem>>
    %c3 = arith.constant 3 : index
    %49 = memref.load %arg1[%c3] : memref<4xf32, #tpu.memory_space<smem>>
    %50 = vector.broadcast %46 : f32 to vector<2x32xf32>
    %51 = arith.mulf %50, %34 : vector<2x32xf32>
    %cst_25 = arith.constant 1.000000e+00 : f32
    %52 = arith.subf %cst_25, %46 : f32
    %53 = vector.broadcast %52 : f32 to vector<2x32xf32>
    %54 = arith.mulf %53, %3 : vector<2x32xf32>
    %55 = arith.addf %51, %54 : vector<2x32xf32>
    %56 = vector.broadcast %47 : f32 to vector<2x32xf32>
    %57 = arith.mulf %56, %37 : vector<2x32xf32>
    %cst_26 = arith.constant 1.000000e+00 : f32
    %58 = arith.subf %cst_26, %47 : f32
    %59 = vector.broadcast %58 : f32 to vector<2x32xf32>
    %60 = arith.mulf %59, %13 : vector<2x32xf32>
    %61 = arith.addf %57, %60 : vector<2x32xf32>
    %62 = vector.broadcast %48 : f32 to vector<2x32xf32>
    %63 = arith.mulf %62, %39 : vector<2x32xf32>
    %c0_27 = arith.constant 0 : index
    %c0_28 = arith.constant 0 : index
    %64 = vector.load %arg9[%c0_27, %c0_28] : memref<1x32xf32, #tpu.memory_space<vmem>>, vector<1x32xf32>
    %65 = vector.broadcast %64 : vector<1x32xf32> to vector<2x32xf32>
    %66 = arith.addf %63, %65 : vector<2x32xf32>
    %67 = vector.broadcast %49 : f32 to vector<2x32xf32>
    %68 = arith.mulf %67, %45 : vector<2x32xf32>
    %c0_29 = arith.constant 0 : index
    %c0_30 = arith.constant 0 : index
    %69 = vector.load %arg10[%c0_29, %c0_30] : memref<1x32xf32, #tpu.memory_space<vmem>>, vector<1x32xf32>
    %70 = vector.broadcast %69 : vector<1x32xf32> to vector<2x32xf32>
    %71 = arith.addf %68, %70 : vector<2x32xf32>
    %cst_31 = arith.constant 1.000000e+00 : f32
    %72 = vector.broadcast %cst_31 : f32 to vector<2x32xf32>
    %73 = arith.divf %72, %61 : vector<2x32xf32>
    %74 = arith.mulf %71, %73 : vector<2x32xf32>
    %75 = arith.mulf %55, %74 : vector<2x32xf32>
    %76 = arith.subf %66, %75 : vector<2x32xf32>
    %77 = vector.shape_cast %74 : vector<2x32xf32> to vector<2x32x1xf32>
    %78 = vector.broadcast %77 : vector<2x32x1xf32> to vector<2x32x256xf32>
    %79 = arith.mulf %0, %78 : vector<2x32x256xf32>
    %80 = vector.shape_cast %76 : vector<2x32xf32> to vector<2x32x1xf32>
    %81 = vector.broadcast %80 : vector<2x32x1xf32> to vector<2x32x256xf32>
    %82 = arith.addf %79, %81 : vector<2x32x256xf32>
    %c0_32 = arith.constant 0 : index
    %c0_33 = arith.constant 0 : index
    %c0_34 = arith.constant 0 : index
    %83 = vector.load %arg11[%c0_32, %c0_33, %c0_34] : memref<2x32x256xf32, #tpu.memory_space<vmem>>, vector<2x32x256xf32>
    tpu.vector_store %arg11[%c0_32, %c0_33, %c0_34], %82 {strides = array<i32>} : memref<2x32x256xf32, #tpu.memory_space<vmem>>, vector<2x32x256xf32>,
    return
  }
  func.func @transform_0(%arg0: i32) -> i32 {
    %c0_i32 = arith.constant 0 : i32
    %c0_i32_0 = arith.constant 0 : i32
    return %c0_i32 : i32
  }
  func.func @transform_1(%arg0: i32) -> (i32, i32, i32) {
    %c0_i32 = arith.constant 0 : i32
    %c0_i32_0 = arith.constant 0 : i32
    %c0_i32_1 = arith.constant 0 : i32
    return %arg0, %c0_i32, %c0_i32_0 : i32, i32, i32
  }
  func.func @transform_2(%arg0: i32) -> (i32, i32) {
    %c0_i32 = arith.constant 0 : i32
    %c0_i32_0 = arith.constant 0 : i32
    %c0_i32_1 = arith.constant 0 : i32
    return %c0_i32, %c0_i32_0 : i32, i32
  }
  func.func @transform_3(%arg0: i32) -> (i32, i32) {
    %c0_i32 = arith.constant 0 : i32
    %c0_i32_0 = arith.constant 0 : i32
    %c0_i32_1 = arith.constant 0 : i32
    return %c0_i32, %c0_i32_0 : i32, i32
  }
  func.func @transform_4(%arg0: i32) -> (i32, i32) {
    %c0_i32 = arith.constant 0 : i32
    %c0_i32_0 = arith.constant 0 : i32
    %c0_i32_1 = arith.constant 0 : i32
    return %c0_i32, %c0_i32_0 : i32, i32
  }
  func.func @transform_5(%arg0: i32) -> (i32, i32) {
    %c0_i32 = arith.constant 0 : i32
    %c0_i32_0 = arith.constant 0 : i32
    %c0_i32_1 = arith.constant 0 : i32
    return %c0_i32, %c0_i32_0 : i32, i32
  }
  func.func @transform_6(%arg0: i32) -> (i32, i32) {
    %c0_i32 = arith.constant 0 : i32
    %c0_i32_0 = arith.constant 0 : i32
    %c0_i32_1 = arith.constant 0 : i32
    return %c0_i32, %c0_i32_0 : i32, i32
  }
  func.func @transform_7(%arg0: i32) -> (i32, i32) {
    %c0_i32 = arith.constant 0 : i32
    %c0_i32_0 = arith.constant 0 : i32
    %c0_i32_1 = arith.constant 0 : i32
    return %c0_i32, %c0_i32_0 : i32, i32
  }
  func.func @transform_8(%arg0: i32) -> (i32, i32) {
    %c0_i32 = arith.constant 0 : i32
    %c0_i32_0 = arith.constant 0 : i32
    %c0_i32_1 = arith.constant 0 : i32
    return %c0_i32, %c0_i32_0 : i32, i32
  }
  func.func @transform_9(%arg0: i32) -> (i32, i32) {
    %c0_i32 = arith.constant 0 : i32
    %c0_i32_0 = arith.constant 0 : i32
    %c0_i32_1 = arith.constant 0 : i32
    return %c0_i32, %c0_i32_0 : i32, i32
  }
  func.func @transform_10(%arg0: i32) -> (i32, i32, i32) {
    %c0_i32 = arith.constant 0 : i32
    %c0_i32_0 = arith.constant 0 : i32
    %c0_i32_1 = arith.constant 0 : i32
    return %arg0, %c0_i32, %c0_i32_0 : i32, i32, i32
  }
}

</mosaic_0001>

<bundles_post_ra>
// kernel: tpu_custom_call.1
= control target key start
LH: loop header
LB: loop body
LE: loop exit
PB: predicated region body
PF: predicated region fallthrough
CT: control target
= control target key end

     0   :  { %15 = vsyncpa [#allocation5], 0  ;;  %s1564_s0 = inlined_call_operand.vmem [shape: f32[4], index: 0, kind: input, shape index: {}]   ;;  %s1565_s1 = inlined_call_operand.hbm [shape: f32[2,32,256], index: 1, kind: input, shape index: {}]   ;;  %s1566_s2 = inlined_call_operand.vmem [shape: f32[32,18], index: 2, kind: input, shape index: {}]   ;;  %s1567_s3 = inlined_call_operand.vmem [shape: f32[1,18], index: 3, kind: input, shape index: {}]   ;;  %s1568_s4 = inlined_call_operand.vmem [shape: f32[16,64], index: 4, kind: input, shape index: {}]   ;;  %s1569_s5 = inlined_call_operand.vmem [shape: f32[1,64], index: 5, kind: input, shape index: {}]   ;;  %s1570_s6 = inlined_call_operand.vmem [shape: f32[2,64], index: 6, kind: input, shape index: {}]   ;;  %s1571_s7 = inlined_call_operand.vmem [shape: f32[1,64], index: 7, kind: input, shape index: {}]   ;;  %s1572_s8 = inlined_call_operand.vmem [shape: f32[1,32], index: 8, kind: input, shape index: {}]   ;;  %s1573_s9 = inlined_call_operand.vmem [shape: f32[1,32], index: 9, kind: input, shape index: {}]   ;;  %s1574_s10 = inlined_call_operand.hbm [shape: f32[2,32,256], index: 10, kind: output, shape index: {}]  }
   0x1   :  { %16 = vsyncpa [#allocation3], 0 }
   0x2   :  { %17 = vsyncpa [#allocation4], 0  ;;  %s24_s15 = sshll.u32 %s1564_s0, 4  ;;  %s25_s15 = int_to_ptr.vmem [resolvable:$true] %s24_s15 }
   0x3   :  { %s1009_s16 = scalar_lea.vmem %s25_s15, 16  ;;  %p1014_p1 = scmp.lt.s32.totalorder %s25_s15, %s25_s15 }
   0x4   :  { %p1010_p0 = scmp.ne.s32.totalorder %s25_s15, %s1009_s16  ;;  %p1015_p2 = scmp.lt.s32.totalorder %s1009_s16, %s1009_s16 }
   0x6   :  { %p1016_p3 = por %p1015_p2, %p1014_p1 }
   0x8   :  { %p1017_p4 = pnand %p1016_p3, %p1010_p0 }
   0xa   :  { %1020 = shalt.err (!%p1017_p4)
}
   0xb   :  { %s1071_s17 = smov [#allocation2]   ;;  %s1072_s18 = smov [#allocation6]  }
   0xc   :  { %27 = dma.vmem_to_smem %s25_s15, 16, %s1071_s17, [#allocation5]  }
   0xd   :  { %s33_s19 = sshll.u32 %s1072_s18, 4  ;;  %s1021_s22 = scalar_lea.hbm %s1565_s1, 2048  ;;  %s34_s19 = int_to_ptr.vmem [resolvable:$true] %s33_s19 }
   0xe   :  { %p1022_p5 = scmp.ne.s32.totalorder %s1565_s1, %s1021_s22  ;;  %p1025_p6 = scmp.lt.u32.totalorder %s1021_s22, %s1565_s1 }
  0x10   :  { %p1027_p7 = pnand %p1025_p6, %p1022_p5 }
  0x12   :  { %1030 = shalt.err (!%p1027_p7)
}
  0x13   :  { %s1031_s26 = scalar_lea.vmem %s34_s19, 2048  ;;  %p1036_p9 = scmp.lt.s32.totalorder %s34_s19, %s34_s19 }
  0x14   :  { %p1032_p8 = scmp.ne.s32.totalorder %s34_s19, %s1031_s26  ;;  %p1037_p10 = scmp.lt.s32.totalorder %s1031_s26, %s1031_s26 }
  0x16   :  { %p1038_p11 = por %p1037_p10, %p1036_p9 }
  0x18   :  { %p1039_p12 = pnand %p1038_p11, %p1032_p8 }
  0x1a   :  { %1042 = shalt.err (!%p1039_p12)
}
  0x1b   :  { %s1073_s27 = smov 256   ;;  %s1074_s28 = smov 16  }
  0x1c   :  { %39 = dma.hbm_to_vmem [thread:$0]  %s1565_s1, 2048, %s34_s19, [#allocation3], %s1073_s27, %s1073_s27, %s1074_s28  }
  0x1d   :  { %1065 = dma.done.wait [#allocation5], 16  }
  0x1e   :  { %1066 = vsyncadd [#allocation5], 4294967280 }
  0x1f   :  { %1067 = dma.done.wait [#allocation3], 2048  }
  0x20   :  { %1068 = vsyncadd [#allocation3], 4294965248 }
  0x21   :  { %62 = sfence }
  0x22   :  { %v1155_v0 = vld [vmem:[#allocation6 + $0x40] sm:$0xff]  ;;  %v1157_v1 = vld [vmem:[#allocation6 + $0x48] sm:$0xff]  ;;  %v1165_v5 = vld [vmem:[#allocation6 + $0x50] sm:$0xff]  ;;  %s1203_s1 = sld [smem:[#allocation2]]  ;;  %v247_v24 = vlaneseq  ;;  %vm258_vm0 = vcmask 130112   ;;  %vm265_vm1 = vcmask 195712  }
  0x23   :  { %v1159_v2 = vld [vmem:[#allocation6] sm:$0xff]  ;;  %v91_v3 = vadd.f32 %v1157_v1, %v1155_v0  ;;  %v1163_v4 = vld [vmem:[#allocation6 + $0x8] sm:$0xff]  ;;  %v1167_v6 = vld [vmem:[#allocation6 + $0x58] sm:$0xff]  ;;  %vm272_vm2 = vcmask 261312   ;;  %vm293_vm3 = vcmask 1041409   ;;  %vm1575_vm4 = vmmov 0  }
  0x24   :  { %v79_v7 = vadd.f32 %v1163_v4, %v1159_v2  ;;  %v1171_v8 = vld [vmem:[#allocation6 + $0x10] sm:$0xff]  ;;  %v1173_v9 = vld [vmem:[#allocation6 + $0x18] sm:$0xff]  ;;  %v94_v10 = vadd.f32 %v1167_v6, %v1165_v5  ;;  %v1179_v12 = vld [vmem:[#allocation6 + $0x60] sm:$0xff]  ;;  %v1205_v25 = vand.u32 127, %v247_v24  ;;  %v1207_v26 = vshrl.u32 %v247_v24, 7  ;;  %s1353_s20 = sld [smem:[#allocation2 + $0x1]] }
  0x25   :  { %92 = vadd.xlane.f32.xlu1 %v91_v3  ;;  %v82_v11 = vadd.f32 %v1173_v9, %v1171_v8  ;;  %v1181_v13 = vld [vmem:[#allocation6 + $0x68] sm:$0xff]  ;;  %v1183_v14 = vld [vmem:[#allocation6 + $0x20] sm:$0xff]  ;;  %v1191_v18 = vld [vmem:[#allocation6 + $0x70] sm:$0xff]  ;;  %vm705_vm6 = vcmask 392512   ;;  %vm712_vm15 = vcmask 458112   ;;  %s1078_s30 = smov 112  }
  0x26   :  { %80 = vadd.xlane.f32.xlu0 %v79_v7  ;;  %v1185_v15 = vld [vmem:[#allocation6 + $0x28] sm:$0xff]  ;;  %v97_v16 = vadd.f32 %v1181_v13, %v1179_v12  ;;  %v1193_v19 = vld [vmem:[#allocation6 + $0x78] sm:$0xff]  ;;  %v1195_v20 = vld [vmem:[#allocation6 + $0x30] sm:$0xff]  ;;  %v253_v27 = vadd.s32 4294967288, %v1205_v25  ;;  %v260_v28 = vadd.s32 4294967280, %v1205_v25  ;;  %v267_v29 = vadd.s32 4294967272, %v1205_v25 }
  0x27   :  { %v85_v17 = vadd.f32 %v1185_v15, %v1183_v14  ;;  %v1197_v21 = vld [vmem:[#allocation6 + $0x38] sm:$0xff]  ;;  %v100_v22 = vadd.f32 %v1193_v19, %v1191_v18  ;;  %v1215_v30 = vsub.s32 %v1205_v25, %v1207_v26 }
  0x28   :  { %v88_v23 = vadd.f32 %v1197_v21, %v1195_v20  ;;  %s616_s11 = ssub.f32 1.0, %s1203_s1  ;;  %v1224_v36 = vsub.s32 %v253_v27, %v1207_v26  ;;  %v1227_v37 = vsub.s32 %v260_v28, %v1207_v26  ;;  %v1230_v38 = vsub.s32 %v267_v29, %v1207_v26 }
  0x29   :  { %95 = vadd.xlane.f32.xlu1 %v94_v10 }
  0x2a   :  { %83 = vadd.xlane.f32.xlu0 %v82_v11  ;;  %v1217_v32 = vstv %s616_s11  ;;  %s1079_s11 = smov 32  }
  0x2d   :  { %98 = vadd.xlane.f32.xlu1 %v97_v16 }
  0x2e   :  { %86 = vadd.xlane.f32.xlu0 %v85_v17 }
  0x31   :  { %101 = vadd.xlane.f32.xlu1 %v100_v22 }
  0x32   :  { %89 = vadd.xlane.f32.xlu0 %v88_v23 }
  0xb2   :  { %v93_v31 = vpop.xlane.xlu1 %92 }
  0xb3   :  { %v1219_v33 = vmul.f32 0.00390625, %v93_v31  ;;  %v81_v34 = vpop.xlane.xlu0 %80 }
  0xb4   :  { %v1221_v35 = vmul.f32 0.00390625, %v81_v34 }
  0xb5   :  { %v277_v39 = vrot.slane %v1219_v33, %v1215_v30  ;;  %v1236_v40 = vmul.f32 %v1217_v32, %v1219_v33  ;;  %v119_v41 = vsub.f32 %v1155_v0, %v1219_v33  ;;  %v120_v42 = vsub.f32 %v1157_v1, %v1219_v33 }
  0xb6   :  { %v252_v43 = vrot.slane %v1221_v35, %v1215_v30  ;;  %v1246_v44 = vmul.f32 %v1217_v32, %v1221_v35  ;;  %v96_v45 = vpop.xlane.xlu1 %95  ;;  %v111_v46 = vsub.f32 %v1159_v2, %v1221_v35  ;;  %v112_v47 = vsub.f32 %v1163_v4, %v1221_v35 }
  0xb7   :  { %v656_v48 = vrot.slane %v1236_v40, %v1215_v30  ;;  %v1254_v49 = vmul.f32 0.00390625, %v96_v45  ;;  %v84_v50 = vpop.xlane.xlu0 %83  ;;  %v135_v51 = vmul.f32 %v119_v41, %v119_v41  ;;  %v136_v52 = vmul.f32 %v120_v42, %v120_v42  ;;  %v347_v40 = vld [vmem:[%s1566_s2] sm:$0xff] }
  0xb8   :  { %v637_v53 = vrot.slane %v1246_v44, %v1215_v30  ;;  %v1258_v54 = vmul.f32 0.00390625, %v84_v50  ;;  %v127_v55 = vmul.f32 %v111_v46, %v111_v46  ;;  %v128_v56 = vmul.f32 %v112_v47, %v112_v47 }
  0xb9   :  { %v281_v57 = vrot.slane %v1254_v49, %v1224_v36  ;;  %v1264_v58 = vmul.f32 %v1217_v32, %v1254_v49  ;;  %v155_v59 = vadd.f32 %v136_v52, %v135_v51  ;;  %v121_v60 = vsub.f32 %v1165_v5, %v1254_v49 }
  0xba   :  { %v257_v61 = vrot.slane %v1258_v54, %v1224_v36  ;;  %v1272_v62 = vmul.f32 %v1217_v32, %v1258_v54  ;;  %v99_v63 = vpop.xlane.xlu1 %98  ;;  %v143_v3 = vadd.f32 %v128_v56, %v127_v55  ;;  %v113_v7 = vsub.f32 %v1171_v8, %v1258_v54 }
  0xbb   :  { %v660_v10 = vrot.slane %v1264_v58, %v1224_v36  ;;  %v109_v11 = vmul.f32 0.00390625, %v99_v63  ;;  %v87_v16 = vpop.xlane.xlu0 %86  ;;  %v114_v17 = vsub.f32 %v1173_v9, %v1258_v54  ;;  %v122_v22 = vsub.f32 %v1167_v6, %v1254_v49  ;;  %v349_v58 = vld [vmem:[%s1566_s2 + $0x10] sm:$0xff] }
  0xbc   :  { %v641_v23 = vrot.slane %v1272_v62, %v1224_v36  ;;  %v105_v24 = vmul.f32 0.00390625, %v87_v16  ;;  %144 = vadd.xlane.f32.xlu0 %v143_v3  ;;  %v129_v27 = vmul.f32 %v113_v7, %v113_v7  ;;  %v137_v28 = vmul.f32 %v121_v60, %v121_v60 }
  0xbd   :  { %v286_v29 = vrot.slane %v109_v11, %v1227_v37  ;;  %v624_v31 = vmul.f32 %v1217_v32, %v109_v11  ;;  %v130_v34 = vmul.f32 %v114_v17, %v114_v17  ;;  %v138_v41 = vmul.f32 %v122_v22, %v122_v22 }
  0xbe   :  { %v264_v42 = vrot.slane %v105_v24, %v1227_v37  ;;  %v620_v45 = vmul.f32 %v1217_v32, %v105_v24  ;;  %v102_v46 = vpop.xlane.xlu1 %101  ;;  %v115_v47 = vsub.f32 %v1183_v14, %v105_v24  ;;  %v116_v49 = vsub.f32 %v1185_v15, %v105_v24 }
  0xbf   :  { %v665_v50 = vrot.slane %v624_v31, %v1227_v37  ;;  %v110_v51 = vmul.f32 0.00390625, %v102_v46  ;;  %v90_v52 = vpop.xlane.xlu0 %89  ;;  %v146_v54 = vadd.f32 %v130_v34, %v129_v27  ;;  %v158_v55 = vadd.f32 %v138_v41, %v137_v28 }
  0xc0   :  { %v646_v56 = vrot.slane %v620_v45, %v1227_v37  ;;  %v106_v60 = vmul.f32 0.00390625, %v90_v52  ;;  %156 = vadd.xlane.f32.xlu0 %v155_v59  ;;  %v131_v62 = vmul.f32 %v115_v47, %v115_v47  ;;  %v132_v63 = vmul.f32 %v116_v49, %v116_v49 }
  0xc1   :  { %v291_v3 = vrot.slane %v110_v51, %v1230_v38  ;;  %v625_v7 = vmul.f32 %v1217_v32, %v110_v51  ;;  %147 = vadd.xlane.f32.xlu1 %v146_v54  ;;  %v123_v16 = vsub.f32 %v1179_v12, %v109_v11  ;;  %v124_v17 = vsub.f32 %v1181_v13, %v109_v11 }
  0xc2   :  { %v271_v22 = vrot.slane %v106_v60, %v1230_v38  ;;  %v621_v24 = vmul.f32 %v1217_v32, %v106_v60  ;;  %v149_v27 = vadd.f32 %v132_v63, %v131_v62  ;;  %v117_v28 = vsub.f32 %v1195_v20, %v106_v60  ;;  %v350_v63 = vld [vmem:[%s1566_s2 + $0x18] sm:$0xff] }
  0xc3   :  { %v139_v31 = vmul.f32 %v123_v16, %v123_v16  ;;  %v140_v59 = vmul.f32 %v124_v17, %v124_v17  ;;  %v118_v34 = vsub.f32 %v1197_v21, %v106_v60  ;;  %v125_v41 = vsub.f32 %v1191_v18, %v110_v51 }
  0xc4   :  { %150 = vadd.xlane.f32.xlu0 %v149_v27  ;;  %v133_v45 = vmul.f32 %v117_v28, %v117_v28  ;;  %v126_v46 = vsub.f32 %v1193_v19, %v110_v51  ;;  %v259_v11 = vsel %vm258_vm0, %v257_v61, %v252_v43  ;;  %v282_v32 = vsel %vm258_vm0, %v281_v57, %v277_v39 }
  0xc5   :  { %159 = vadd.xlane.f32.xlu1 %v158_v55  ;;  %v161_v47 = vadd.f32 %v140_v59, %v139_v31  ;;  %v134_v49 = vmul.f32 %v118_v34, %v118_v34  ;;  %v141_v52 = vmul.f32 %v125_v41, %v125_v41  ;;  %v266_v54 = vsel %vm265_vm1, %v264_v42, %v259_v11 }
  0xc6   :  { %v142_v60 = vmul.f32 %v126_v46, %v126_v46  ;;  %v273_v62 = vsel %vm272_vm2, %v271_v22, %v266_v54  ;;  %v287_v51 = vsel %vm265_vm1, %v286_v29, %v282_v32  ;;  %v642_v35 = vsel %vm258_vm0, %v641_v23, %v637_v53 }
  0xc7   :  { %v152_v43 = vadd.f32 %v134_v49, %v133_v45  ;;  %v292_v33 = vsel %vm272_vm2, %v291_v3, %v287_v51  ;;  %v647_v39 = vsel %vm265_vm1, %v646_v56, %v642_v35  ;;  %v651_v57 = vrot.slane %v621_v24, %v1230_v38 }
  0xc8   :  { %v1321_v61 = vsel %vm293_vm3, %v292_v33, %v273_v62  ;;  %v661_v44 = vsel %vm258_vm0, %v660_v10, %v656_v48  ;;  %v670_v53 = vrot.slane %v625_v7, %v1230_v38  ;;  %v164_v23 = vadd.f32 %v142_v60, %v141_v52  ;;  %v348_v48 = vld [vmem:[%s1566_s2 + $0x8] sm:$0xff]  ;;  %s677_s2 = ssub.f32 1.0, %s1353_s20 }
  0xc9   :  { %162 = vadd.xlane.f32.xlu1 %v161_v47  ;;  %153 = vadd.xlane.f32.xlu0 %v152_v43  ;;  %v652_v29 = vsel %vm272_vm2, %v651_v57, %v647_v39  ;;  %v666_v42 = vsel %vm265_vm1, %v665_v50, %v661_v44  ;;  %v1075_v10 = vmov 0.0|0.0   ;;  %v966_v50 = vpack.c.bf16 %v348_v48, %v347_v40 }
  0xca   :  { %v671_v55 = vsel %vm272_vm2, %v670_v53, %v666_v42  ;;  %965 = vmatprep.subr.bf16.mxu0 %v1075_v10  ;;  %v1077_v3 = vmov 0.0   ;;  %971 = vmatprep.subr.bf16.mxu1 %v1075_v10  ;;  %v969_v7 = vpack.c.bf16 %v350_v63, %v349_v58  ;;  %v695_v47 = vadd.s32 4294967264, %v1205_v25 }
  0xcb   :  { %v1335_v56 = vsel %vm293_vm3, %v671_v55, %v652_v29  ;;  %950 = vmatprep.mubr.msk.f32.mxu0 %vm1575_vm4, %v1077_v3  ;;  %957 = vmatprep.mubr.msk.f32.mxu1 %vm1575_vm4, %v1077_v3  ;;  %v700_v49 = vadd.s32 4294967256, %v1205_v25  ;;  %v707_v60 = vadd.s32 4294967248, %v1205_v25  ;;  %v714_v51 = vadd.s32 4294967240, %v1205_v25 }
  0xcc   :  { %967 = vmatpush3.bf16.msra.mxu0 %v966_v50  ;;  %v1371_v39 = vstv %s677_s2  ;;  %v1375_v44 = vsub.s32 %v695_v47, %v1207_v26 }
  0xcd   :  { %165 = vadd.xlane.f32.xlu1 %v164_v23  ;;  %968 = vmatprep.subr.bf16.mxu0 %v1075_v10  ;;  %v1378_v53 = vsub.s32 %v700_v49, %v1207_v26  ;;  %v1385_v42 = vsub.s32 %v707_v60, %v1207_v26  ;;  %v1388_v58 = vsub.s32 %v714_v51, %v1207_v26 }
  0xd0   :  { %970 = vmatpush3.bf16.msra.mxu0 %v969_v7 }
 0x149   :  { %v145_v16 = vpop.xlane.xlu0 %144 }
 0x14a   :  { %v167_v17 = vmul.f32 0.003921569, %v145_v16 }
 0x14c   :  { %v175_v22 = vadd.f32 1e-06, %v167_v17 }
 0x14d   :  { %v157_v24 = vpop.xlane.xlu0 %156 }
 0x14e   :  { %985 = vrsqrt.f32 %v175_v22  ;;  %v148_v27 = vpop.xlane.xlu1 %147  ;;  %v171_v31 = vmul.f32 0.003921569, %v157_v24  ;;  %vm185_vm5 = vcmp.eq.f32.partialorder %v175_v22, inf  ;;  %v188_v40 = vand.u32 2147483648, %v175_v22 }
 0x14f   :  { %v168_v28 = vmul.f32 0.003921569, %v148_v27  ;;  %vm187_vm7 = vcmp.eq.f32.partialorder %v175_v22, 0.0 }
 0x150   :  { %v1357_v34 = vadd.f32 1e-06, %v171_v31 }
 0x151   :  { %v1355_v59 = vadd.f32 1e-06, %v168_v28  ;;  %v151_v41 = vpop.xlane.xlu0 %150 }
 0x152   :  { %v160_v45 = vpop.xlane.xlu1 %159  ;;  %v169_v46 = vmul.f32 0.003921569, %v151_v41  ;;  %vm213_vm10 = vcmp.eq.f32.partialorder %v1357_v34, inf  ;;  %vm215_vm11 = vcmp.eq.f32.partialorder %v1357_v34, 0.0 }
 0x153   :  { %987 = vrsqrt.f32 %v1355_v59  ;;  %v172_v11 = vmul.f32 0.003921569, %v160_v45  ;;  %vm192_vm8 = vcmp.eq.f32.partialorder %v1355_v59, inf  ;;  %vm194_vm9 = vcmp.eq.f32.partialorder %v1355_v59, 0.0 }
 0x154   :  { %989 = vrsqrt.f32 %v1357_v34  ;;  %v1362_v32 = vadd.f32 1e-06, %v169_v46  ;;  %v195_v50 = vand.u32 2147483648, %v1355_v59 }
 0x155   :  { %v1367_v62 = vadd.f32 1e-06, %v172_v11 }
 0x156   :  { %v163_v52 = vpop.xlane.xlu1 %162  ;;  %v154_v54 = vpop.xlane.xlu0 %153  ;;  %991 = vrsqrt.f32 %v1362_v32  ;;  %vm199_vm12 = vcmp.eq.f32.partialorder %v1362_v32, inf  ;;  %v202_v27 = vand.u32 2147483648, %v1362_v32  ;;  %vm201_vm14 = vcmp.eq.f32.partialorder %v1362_v32, 0.0 }
 0x157   :  { %v173_v43 = vmul.f32 0.003921569, %v163_v52  ;;  %v170_v33 = vmul.f32 0.003921569, %v154_v54  ;;  %993 = vrsqrt.f32 %v1367_v62  ;;  %vm220_vm13 = vcmp.eq.f32.partialorder %v1367_v62, inf }
 0x158   :  { %v986_v35 = vpop.eup %985  ;;  %vm222_vm3 = vcmp.eq.f32.partialorder %v1367_v62, 0.0  ;;  %v223_v45 = vand.u32 2147483648, %v1367_v62 }
 0x159   :  { %v184_v57 = vmul.f32 %v986_v35, %v175_v22  ;;  %v1380_v23 = vadd.f32 1e-06, %v173_v43  ;;  %v1382_v29 = vadd.f32 1e-06, %v170_v33 }
 0x15a   :  { %v166_v25 = vpop.xlane.xlu1 %165 }
 0x15b   :  { %v186_v55 = vsel %vm185_vm5, %v175_v22, %v184_v57  ;;  %v174_v48 = vmul.f32 0.003921569, %v166_v25  ;;  %995 = vrsqrt.f32 %v1380_v23  ;;  %v216_v22 = vand.u32 2147483648, %v1357_v34 }
 0x15c   :  { %997 = vrsqrt.f32 %v1382_v29  ;;  %v189_v7 = vsel %vm187_vm7, %v188_v40, %v186_v55  ;;  %vm227_vm5 = vcmp.eq.f32.partialorder %v1380_v23, inf  ;;  %v230_v49 = vand.u32 2147483648, %v1380_v23 }
 0x15d   :  { %v988_v10 = vpop.eup %987  ;;  %v1395_v63 = vadd.f32 1e-06, %v174_v48  ;;  %v679_v31 = vmul.f32 %v1371_v39, %v189_v7  ;;  %vm206_vm7 = vcmp.eq.f32.partialorder %v1382_v29, inf  ;;  %v209_v60 = vand.u32 2147483648, %v1382_v29 }
 0x15e   :  { %v990_v16 = vpop.eup %989  ;;  %v191_v17 = vmul.f32 %v988_v10, %v1355_v59  ;;  %vm229_vm4 = vcmp.eq.f32.partialorder %v1380_v23, 0.0  ;;  %v307_v25 = vrot.slane %v189_v7, %v1215_v30 }
 0x15f   :  { %v212_v24 = vmul.f32 %v990_v16, %v1357_v34  ;;  %999 = vrsqrt.f32 %v1395_v63  ;;  %v699_v35 = vrot.slane %v679_v31, %v1375_v44  ;;  %v237_v16 = vand.u32 2147483648, %v1395_v63 }
 0x160   :  { %v193_v28 = vsel %vm192_vm8, %v1355_v59, %v191_v17  ;;  %v992_v41 = vpop.eup %991  ;;  %vm208_vm8 = vcmp.eq.f32.partialorder %v1382_v29, 0.0 }
 0x161   :  { %v196_v46 = vsel %vm194_vm9, %v195_v50, %v193_v28  ;;  %v214_v11 = vsel %vm213_vm10, %v1357_v34, %v212_v24  ;;  %v198_v47 = vmul.f32 %v992_v41, %v1362_v32  ;;  %v994_v54 = vpop.eup %993  ;;  %vm719_vm9 = vcmask 523712  }
 0x162   :  { %v680_v52 = vmul.f32 %v1371_v39, %v196_v46  ;;  %v219_v59 = vmul.f32 %v994_v54, %v1367_v62  ;;  %v217_v57 = vsel %vm215_vm11, %v216_v22, %v214_v11  ;;  %v311_v55 = vrot.slane %v196_v46, %v1224_v36 }
 0x163   :  { %v200_v51 = vsel %vm199_vm12, %v1362_v32, %v198_v47  ;;  %vm234_vm10 = vcmp.eq.f32.partialorder %v1395_v63, inf  ;;  %vm342_vm12 = vcmask 1043459   ;;  %vm236_vm11 = vcmp.eq.f32.partialorder %v1395_v63, 0.0 }
 0x164   :  { %v704_v43 = vrot.slane %v680_v52, %v1378_v53  ;;  %v203_v33 = vsel %vm201_vm14, %v202_v27, %v200_v51  ;;  %v221_v48 = vsel %vm220_vm13, %v1367_v62, %v219_v59  ;;  %vm345_vm14 = vcmask 1041408  }
 0x165   :  { %v996_v40 = vpop.eup %995  ;;  %v681_v10 = vmul.f32 %v1371_v39, %v203_v33  ;;  %v224_v7 = vsel %vm222_vm3, %v223_v45, %v221_v48  ;;  %v326_v22 = vrot.slane %v217_v57, %v1215_v30  ;;  %v683_v24 = vmul.f32 %v1371_v39, %v217_v57 }
 0x166   :  { %v706_v32 = vsel %vm705_vm6, %v704_v43, %v699_v35  ;;  %v998_v50 = vpop.eup %997  ;;  %v226_v34 = vmul.f32 %v996_v40, %v1380_v23  ;;  %v684_v27 = vmul.f32 %v1371_v39, %v224_v7  ;;  %v312_v62 = vsel %vm258_vm0, %v311_v55, %v307_v25 }
 0x167   :  { %v205_v17 = vmul.f32 %v998_v50, %v1382_v29  ;;  %v316_v41 = vrot.slane %v203_v33, %v1227_v37  ;;  %v711_v45 = vrot.slane %v681_v10, %v1385_v42  ;;  %v330_v47 = vrot.slane %v224_v7, %v1224_v36  ;;  %v434_v7 = vld [vmem:[%s1568_s4 + $0x8] sm:$0xff] }
 0x168   :  { %v228_v31 = vsel %vm227_vm5, %v1380_v23, %v226_v34  ;;  %v433_v34 = vld [vmem:[%s1568_s4] sm:$0xff] }
 0x169   :  { %v1000_v28 = vpop.eup %999  ;;  %v207_v30 = vsel %vm206_vm7, %v1382_v29, %v205_v17  ;;  %v231_v11 = vsel %vm229_vm4, %v230_v49, %v228_v31  ;;  %v713_v51 = vsel %vm712_vm15, %v711_v45, %v706_v32  ;;  %v728_v49 = vrot.slane %v684_v27, %v1378_v53  ;;  %v516_v27 = vld [vmem:[%s1570_s6] sm:$0x3] }
 0x16a   :  { %v233_v46 = vmul.f32 %v1000_v28, %v1395_v63  ;;  %v210_v52 = vsel %vm208_vm8, %v209_v60, %v207_v30  ;;  %v335_v54 = vrot.slane %v231_v11, %v1227_v37  ;;  %v685_v59 = vmul.f32 %v1371_v39, %v231_v11  ;;  %v931_v28 = vld [vmem:[%s1573_s9] ss:$0 sm:$0xff] }
 0x16b   :  { %v321_v43 = vrot.slane %v210_v52, %v1230_v38  ;;  %v682_v23 = vmul.f32 %v1371_v39, %v210_v52  ;;  %v317_v29 = vsel %vm265_vm1, %v316_v41, %v312_v62  ;;  %v724_v37 = vrot.slane %v683_v24, %v1375_v44  ;;  %761 = vrot.lane.b32.xlu1 %v931_v28, %s1079_s11  ;;  %v921_v62 = vld [vmem:[%s1569_s5] ss:$0 sm:$0xff]  ;;  %s929_s5 = sld [smem:[#allocation2 + $0x3]] }
 0x16c   :  { %v235_v35 = vsel %vm234_vm10, %v1395_v63, %v233_v46  ;;  %v733_v60 = vrot.slane %v685_v59, %v1385_v42  ;;  %v331_v33 = vsel %vm258_vm0, %v330_v47, %v326_v22  ;;  %vm358_vm4 = vcmask 261120  }
 0x16d   :  { %v238_v36 = vsel %vm236_vm11, %v237_v16, %v235_v35  ;;  %v718_v55 = vrot.slane %v682_v23, %v1388_v58  ;;  %v322_v40 = vsel %vm272_vm2, %v321_v43, %v317_v29  ;;  %v336_v53 = vsel %vm265_vm1, %v335_v54, %v331_v33 }
 0x16e   :  { %v340_v57 = vrot.slane %v238_v36, %v1230_v38  ;;  %v686_v25 = vmul.f32 %v1371_v39, %v238_v36  ;;  %v729_v63 = vsel %vm705_vm6, %v728_v49, %v724_v37  ;;  %v972_v16 = vpack.c.bf16 %v434_v7, %v433_v34 }
 0x16f   :  { %v720_v44 = vsel %vm719_vm9, %v718_v55, %v713_v51  ;;  %v734_v42 = vsel %vm712_vm15, %v733_v60, %v729_v63  ;;  %vm442_vm0 = vcmask 130048   ;;  %vm1576_vm1 = vmmov 0   ;;  %v923_v51 = vld [vmem:[%s1571_s7] ss:$0 sm:$0xff]  ;;  %s1080_s7 = smov 96  }
 0x170   :  { %v341_v48 = vsel %vm272_vm2, %v340_v57, %v336_v53  ;;  %v738_v10 = vrot.slane %v686_v25, %v1388_v58  ;;  %973 = vmatpush3.bf16.msra.mxu1 %v972_v16  ;;  %vm526_vm2 = vcmask 15360   ;;  %v614_v45 = vstv %s1203_s1  ;;  %s928_s1 = sld [smem:[#allocation2 + $0x2]] }
 0x171   :  { %v343_v38 = vsel %vm342_vm12, %v341_v48, %v322_v40  ;;  %960 = vmatprep.subr.mxu1 %v1077_v3  ;;  %v675_v11 = vstv %s1353_s20  ;;  %v753_v37 = vstv %s929_s5  ;;  %v797_v48 = vsub.s32 3, %v1207_v26 }
 0x172   :  { %v346_v39 = vsel %vm345_vm14, %v1321_v61, %v343_v38  ;;  %v739_v32 = vsel %vm719_vm9, %v738_v10, %v734_v42  ;;  %v919_v61 = vld [vmem:[%s1567_s3] ss:$0 sm:$0xff] }
 0x173   :  { %951 = vmatmul.mubr.msk.f32.vlgmr.msra.gmra.mrb[0].mxu0 %vm358_vm4, %v346_v39  ;;  %v740_v50 = vsel %vm342_vm12, %v739_v32, %v720_v44  ;;  %v930_v39 = vld [vmem:[%s1572_s8] ss:$0 sm:$0xff]  ;;  %s1081_s8 = smov [#allocation7]  }
 0x174   :  { %s906_s16 = sshll.u32 %s1081_s8, 4  ;;  %s907_s16 = int_to_ptr.vmem [resolvable:$true] %s906_s16 }
 0x175   :  { %s1043_s17 = scalar_lea.vmem %s907_s16, 2048  ;;  %p1048_p0 = scmp.lt.s32.totalorder %s907_s16, %s907_s16 }
 0x176   :  { %v743_v10 = vstv %s928_s1  ;;  %p1044_p13 = scmp.ne.s32.totalorder %s907_s16, %s1043_s17  ;;  %p1049_p1 = scmp.lt.s32.totalorder %s1043_s17, %s1043_s17 }
 0x178   :  { %p1050_p2 = por %p1049_p1, %p1048_p0 }
 0x17a   :  { %p1051_p3 = pnand %p1050_p2, %p1044_p13 }
 0x1dd   :  { %v762_v33 = vpop.permute.xlu1 %761 }
 0x246   :  { %v428_v58 = vpop.f32.mrb[0].mxu0 }
 0x247   :  { %v429_v17 = vadd.f32 %v919_v61, %v428_v58  ;;  %v952_v22 = vpop.f32.mrb[1].mxu0  ;;  %v852_v58 = vsub.s32 1, %v1207_v26 }
 0x249   :  { %v432_v24 = vmax.f32 %v429_v17, 0.0 }
 0x24b   :  { %524 = vrot.lane.b32.xlu0 %v432_v24, %s1078_s30  ;;  %958 = vmatmul.mubr.msk.f32.vlgmr.msra.gmra.mrb[0].mxu1 %vm442_vm0, %v432_v24 }
 0x24c   :  { %961 = vmatpush3.msk.msra.mxu1 %vm345_vm14, %v516_v27  ;;  %962 = vmatprep.mubr.msk.f32.mxu1 %vm1576_vm1, %v1077_v3 }
 0x2bd   :  { %v525_v31 = vpop.permute.xlu0 %524 }
 0x2be   :  { %963 = vmatmul.mubr.msk.f32.vlgmr.msra.gmra.mrb[2].mxu1 %vm526_vm2, %v525_v31 }
 0x31e   :  { %v512_v41 = vpop.f32.mrb[0].mxu1 }
 0x31f   :  { %v513_v46 = vadd.f32 %v921_v62, %v512_v41  ;;  %v959_v30 = vpop.f32.mrb[1].mxu1 }
 0x321   :  { %v602_v47 = vmax.f32 %v513_v46, 0.0  ;;  %v615_v3 = vmul.f32 %v614_v45, %v513_v46 }
 0x323   :  { %v676_v52 = vmul.f32 %v675_v11, %v602_v47  ;;  %v674_v54 = vadd.f32 %v1335_v56, %v615_v3  ;;  %v777_v56 = vsub.s32 2, %v1207_v26 }
 0x325   :  { %v742_v59 = vadd.f32 %v740_v50, %v676_v52  ;;  %v833_v50 = vsub.s32 0, %v1207_v26 }
 0x391   :  { %v598_v35 = vpop.f32.mrb[2].mxu1 }
 0x392   :  { %v599_v43 = vadd.f32 %v923_v51, %v598_v35  ;;  %v964_v23 = vpop.f32.mrb[3].mxu1 }
 0x394   :  { %v926_v49 = vmul.f32 -1.442695, %v599_v43 }
 0x396   :  { %1001 = vpow2.f32 %v926_v49 }
 0x3a0   :  { %v1002_v36 = vpop.eup %1001 }
 0x3a1   :  { %v607_v29 = vadd.f32 1.0, %v1002_v36 }
 0x3a3   :  { %1003 = vrcp.f32 %v607_v29 }
 0x3a4   :  { %1005 = vrcp.f32 %v742_v59 }
 0x3a5   :  { %1007 = vtanh.f32 %v599_v43 }
 0x3ad   :  { %v1004_v60 = vpop.eup %1003 }
 0x3ae   :  { %v754_v57 = vmul.f32 %v1004_v60, %v753_v37  ;;  %v1006_v55 = vpop.eup %1005 }
 0x3af   :  { %v1008_v42 = vpop.eup %1007 }
 0x3b0   :  { %v764_v25 = vadd.f32 %v762_v33, %v754_v57  ;;  %v744_v38 = vmul.f32 %v1008_v42, %v743_v10 }
 0x3b2   :  { %v767_v40 = vmul.f32 %v1006_v55, %v764_v25  ;;  %v752_v34 = vadd.f32 %v930_v39, %v744_v38 }
 0x3b4   :  { %v778_v53 = vrot.slane %v767_v40, %v777_v56  ;;  %v769_v63 = vrot.slane %v767_v40, 2  ;;  %v798_v44 = vrot.slane %v767_v40, %v797_v48 }
 0x3b6   :  { %785 = vbcast.lane.b32.xlu0 %v778_v53, 296  ;;  %770 = vrot.lane.b32.xlu1 %v769_v63, %s1080_s7 }
 0x3ba   :  { %793 = vbcast.lane.b32.xlu0 %v778_v53, 312  ;;  %781 = vbcast.lane.b32.xlu1 %v778_v53, 288 }
 0x3be   :  { %805 = vbcast.lane.b32.xlu0 %v798_v44, 296  ;;  %789 = vbcast.lane.b32.xlu1 %v778_v53, 304 }
 0x3c2   :  { %813 = vbcast.lane.b32.xlu0 %v798_v44, 312  ;;  %801 = vbcast.lane.b32.xlu1 %v798_v44, 288 }
 0x3c6   :  { %809 = vbcast.lane.b32.xlu1 %v798_v44, 304 }
 0x428   :  { %v771_v32 = vpop.permute.xlu1 %770  ;;  %v786_v22 = vpop.permute.xlu0 %785 }
 0x429   :  { %v773_v7 = vmul.f32 %v771_v32, %v674_v54  ;;  %v817_v46 = vmul.f32 %v786_v22, %v1171_v8  ;;  %v818_v30 = vmul.f32 %v786_v22, %v1173_v9 }
 0x42b   :  { %v774_v16 = vsub.f32 %v752_v34, %v773_v7 }
 0x42c   :  { %v782_v24 = vpop.permute.xlu1 %781  ;;  %v794_v27 = vpop.permute.xlu0 %793 }
 0x42d   :  { %v834_v61 = vrot.slane %v774_v16, %v833_v50  ;;  %v853_v17 = vrot.slane %v774_v16, %v852_v58  ;;  %v815_v26 = vmul.f32 %v782_v24, %v1159_v2  ;;  %v816_v11 = vmul.f32 %v782_v24, %v1163_v4 }
 0x42e   :  { %v821_v35 = vmul.f32 %v794_v27, %v1195_v20  ;;  %v822_v43 = vmul.f32 %v794_v27, %v1197_v21 }
 0x42f   :  { %840 = vbcast.lane.b32.xlu0 %v834_v61, 264  ;;  %836 = vbcast.lane.b32.xlu1 %v834_v61, 256 }
 0x430   :  { %v790_v28 = vpop.permute.xlu1 %789  ;;  %v806_v31 = vpop.permute.xlu0 %805 }
 0x431   :  { %v819_v23 = vmul.f32 %v790_v28, %v1183_v14  ;;  %v820_v8 = vmul.f32 %v790_v28, %v1185_v15  ;;  %v825_v37 = vmul.f32 %v806_v31, %v1165_v5  ;;  %v826_v20 = vmul.f32 %v806_v31, %v1167_v6 }
 0x433   :  { %848 = vbcast.lane.b32.xlu0 %v834_v61, 280  ;;  %844 = vbcast.lane.b32.xlu1 %v834_v61, 272 }
 0x434   :  { %v802_v62 = vpop.permute.xlu1 %801  ;;  %v814_v41 = vpop.permute.xlu0 %813 }
 0x435   :  { %v823_v21 = vmul.f32 %v802_v62, %v1155_v0  ;;  %v824_v14 = vmul.f32 %v802_v62, %v1157_v1  ;;  %v829_v5 = vmul.f32 %v814_v41, %v1191_v18  ;;  %v830_v6 = vmul.f32 %v814_v41, %v1193_v19 }
 0x437   :  { %859 = vbcast.lane.b32.xlu0 %v853_v17, 264  ;;  %855 = vbcast.lane.b32.xlu1 %v853_v17, 256 }
 0x438   :  { %v810_v45 = vpop.permute.xlu1 %809 }
 0x439   :  { %v827_v0 = vmul.f32 %v810_v45, %v1179_v12  ;;  %v828_v1 = vmul.f32 %v810_v45, %v1181_v13 }
 0x43b   :  { %867 = vbcast.lane.b32.xlu0 %v853_v17, 280  ;;  %863 = vbcast.lane.b32.xlu1 %v853_v17, 272 }
 0x4a1   :  { %v841_v47 = vpop.permute.xlu0 %840  ;;  %v837_v3 = vpop.permute.xlu1 %836 }
 0x4a2   :  { %v871_v52 = vadd.f32 %v841_v47, %v817_v46  ;;  %v872_v54 = vadd.f32 %v841_v47, %v818_v30  ;;  %v869_v59 = vadd.f32 %v837_v3, %v815_v26  ;;  %v870_v51 = vadd.f32 %v837_v3, %v816_v11 }
 0x4a4   :  { %887 = vst [vmem:[#allocation7 + $0x10] sm:$0xff] %v871_v52  ;;  %888 = vst [vmem:[#allocation7 + $0x18] sm:$0xff] %v872_v54 }
 0x4a5   :  { %885 = vst [vmem:[#allocation7] sm:$0xff] %v869_v59  ;;  %886 = vst [vmem:[#allocation7 + $0x8] sm:$0xff] %v870_v51  ;;  %v849_v2 = vpop.permute.xlu0 %848  ;;  %v845_v4 = vpop.permute.xlu1 %844 }
 0x4a6   :  { %v875_v9 = vadd.f32 %v849_v2, %v821_v35  ;;  %v876_v49 = vadd.f32 %v849_v2, %v822_v43  ;;  %v873_v36 = vadd.f32 %v845_v4, %v819_v23  ;;  %v874_v29 = vadd.f32 %v845_v4, %v820_v8 }
 0x4a8   :  { %891 = vst [vmem:[#allocation7 + $0x30] sm:$0xff] %v875_v9  ;;  %892 = vst [vmem:[#allocation7 + $0x38] sm:$0xff] %v876_v49 }
 0x4a9   :  { %889 = vst [vmem:[#allocation7 + $0x20] sm:$0xff] %v873_v36  ;;  %890 = vst [vmem:[#allocation7 + $0x28] sm:$0xff] %v874_v29  ;;  %v860_v15 = vpop.permute.xlu0 %859  ;;  %v856_v60 = vpop.permute.xlu1 %855 }
 0x4aa   :  { %v879_v33 = vadd.f32 %v860_v15, %v825_v37  ;;  %v880_v57 = vadd.f32 %v860_v15, %v826_v20  ;;  %v877_v56 = vadd.f32 %v856_v60, %v823_v21  ;;  %v878_v25 = vadd.f32 %v856_v60, %v824_v14 }
 0x4ac   :  { %895 = vst [vmem:[#allocation7 + $0x50] sm:$0xff] %v879_v33  ;;  %896 = vst [vmem:[#allocation7 + $0x58] sm:$0xff] %v880_v57 }
 0x4ad   :  { %893 = vst [vmem:[#allocation7 + $0x40] sm:$0xff] %v877_v56  ;;  %894 = vst [vmem:[#allocation7 + $0x48] sm:$0xff] %v878_v25  ;;  %v868_v55 = vpop.permute.xlu0 %867  ;;  %v864_v40 = vpop.permute.xlu1 %863 }
 0x4ae   :  { %v883_v53 = vadd.f32 %v868_v55, %v829_v5  ;;  %v884_v63 = vadd.f32 %v868_v55, %v830_v6  ;;  %v881_v48 = vadd.f32 %v864_v40, %v827_v0  ;;  %v882_v44 = vadd.f32 %v864_v40, %v828_v1 }
 0x4b0   :  { %899 = vst [vmem:[#allocation7 + $0x70] sm:$0xff] %v883_v53  ;;  %900 = vst [vmem:[#allocation7 + $0x78] sm:$0xff] %v884_v63 }
 0x4b1   :  { %897 = vst [vmem:[#allocation7 + $0x60] sm:$0xff] %v881_v48  ;;  %898 = vst [vmem:[#allocation7 + $0x68] sm:$0xff] %v882_v44 }
 0x4b2   :  { %1054 = shalt.err (!%p1051_p3)
}
 0x4b3   :  { %s1055_s20 = scalar_lea.hbm %s1574_s10, 2048 }
 0x4b4   :  { %p1056_p4 = scmp.ne.s32.totalorder %s1574_s10, %s1055_s20  ;;  %p1059_p5 = scmp.lt.u32.totalorder %s1055_s20, %s1574_s10 }
 0x4b6   :  { %p1061_p6 = pnand %p1059_p5, %p1056_p4 }
 0x4b8   :  { %1064 = shalt.err (!%p1061_p6)
}
 0x4b9   :  { %912 = dma.vmem_to_hbm [thread:$0]  %s907_s16, 2048, %s1574_s10, [#allocation4], %s1073_s27, %s1073_s27, %s1074_s28  }
 0x4ba   :  { %1069 = dma.done.wait [#allocation4], 2048  }
 0x4bb   :  { %1070 = vsyncadd [#allocation4], 4294965248 }
 0x4bc   :  { %916 = vsyncpa [#allocation3], 1 }
 0x4bd   :  { %917 = vsyncpa [#allocation4], 1 }
 0x4be   :  { %918 = vsyncpa [#allocation5], 1 }

</bundles_post_ra>
